<compile_context>
chip_gen: v5e
topology: v5e:2x2
jax: 0.10.0
libtpu: 0.0.40
codegen_flags: <defaults>
</compile_context>

<pallas_src>
import jax
import jax.numpy as jnp
from jax import lax
from jax.experimental import pallas as pl
from jax.experimental.pallas import tpu as pltpu

# Fixed (non-trainable) Sobel weights, identical to the PyTorch module (used by the
# pure-JAX reference check only; the kernel uses the separable form).
_SOBEL_X = ((-1.0, 0.0, 1.0), (-2.0, 0.0, 2.0), (-1.0, 0.0, 1.0))
_SOBEL_Y = ((1.0, 2.0, 1.0), (0.0, 0.0, 0.0), (-1.0, -2.0, -1.0))


# ---------------------------------------------------------------------------
# In-kernel helpers
# ---------------------------------------------------------------------------
def _col_left(a, col_last):
    """out[:, j] = a[:, j+1]; zero at j == W-1 (F.conv2d zero padding)."""
    if col_last is not None:                      # lane-aligned: XLU roll + reused mask
        return jnp.where(col_last, 0.0, pltpu.roll(a, a.shape[-1] - 1, axis=1))
    return jnp.concatenate([a[:, 1:], jnp.zeros_like(a[:, :1])], axis=1)


def _col_right(a, col_first):
    """out[:, j] = a[:, j-1]; zero at j == 0."""
    if col_first is not None:
        return jnp.where(col_first, 0.0, pltpu.roll(a, 1, axis=1))
    return jnp.concatenate([jnp.zeros_like(a[:, :1]), a[:, :-1]], axis=1)


def _grad_band(x_ref, top_ref, bot_ref, masks, band_i, n_bands):
    """|Sobel_x| + |Sobel_y| for one (tile_h, W) row band of one Y-channel image.

    Separable form:  Kx = [1,2,1]^T (x) [-1,0,1]  ->  gx = V[:, j+1] - V[:, j-1]
                     Ky = [1,0,-1]^T (x) [1,2,1]  ->  gy = D[:, j-1] + 2D[:, j] + D[:, j+1]
    with V = x[i-1] + 2x[i] + x[i+1] and D = x[i-1] - x[i+1].
    """
    row_first, row_last, col_first, col_last = masks
    x = x_ref[0, 0].astype(jnp.float32)                      # (tile_h, W)
    th = x.shape[0]
    sh = top_ref.shape[2]
    # Halo rows just above / below this band; zeroed at the global image border so
    # the stencil matches F.conv2d(padding=1) zero padding.
    ra = top_ref[0, 0, sh - 1:sh, :].astype(jnp.float32)     # (1, W) row above band
    rb = bot_ref[0, 0, 0:1, :].astype(jnp.float32)           # (1, W) row below band
    ra = jnp.where(band_i == 0, 0.0, ra)
    rb = jnp.where(band_i == n_bands - 1, 0.0, rb)

    if row_first is not None:        # sublane roll (XLU) + one row splice (VPU select)
        x_up = jnp.where(row_first, ra, pltpu.roll(x, 1, axis=0))        # x[i-1, :]
        x_dn = jnp.where(row_last, rb, pltpu.roll(x, th - 1, axis=0))    # x[i+1, :]
    else:                            # unaligned fallback: slice + concat
        x_up = jnp.concatenate([ra, x[:th - 1, :]], axis=0)
        x_dn = jnp.concatenate([x[1:, :], rb], axis=0)

    v = x_up + 2.0 * x + x_dn                                # vertical [1, 2, 1]
    d = x_up - x_dn                                          # vertical [1, 0, -1]
    gx = _col_left(v, col_last) - _col_right(v, col_first)
    gy = _col_right(d, col_first) + 2.0 * d + _col_left(d, col_last)
    return jnp.abs(gx) + jnp.abs(gy)


def _sobel_loss_kernel(a_ref, at_ref, ab_ref,
                       b_ref, bt_ref, bb_ref,
                       f_ref, ft_ref, fb_ref,
                       ga_ref, gb_ref, lp_ref):
    band_i = pl.program_id(1)
    n_bands = pl.num_programs(1)
    th, w = a_ref.shape[2], a_ref.shape[3]

    # Edge masks hoisted out of the shift helpers: one iota + compare set shared by
    # all shifts of all three images.
    roll_cols = (w % 128 == 0)
    roll_rows = roll_cols and (th % 8 == 0)
    col_first = col_last = row_first = row_last = None
    if roll_cols:
        cid = lax.broadcasted_iota(jnp.int32, (th, w), 1)
        col_first, col_last = (cid == 0), (cid == w - 1)
    if roll_rows:
        rid = lax.broadcasted_iota(jnp.int32, (th, w), 0)
        row_first, row_last = (rid == 0), (rid == th - 1)
    masks = (row_first, row_last, col_first, col_last)

    ga = _grad_band(a_ref, at_ref, ab_ref, masks, band_i, n_bands)   # gradient_A band
    gb = _grad_band(b_ref, bt_ref, bb_ref, masks, band_i, n_bands)   # gradient_B band
    gf = _grad_band(f_ref, ft_ref, fb_ref, masks, band_i, n_bands)   # gradient_fused
    ga_ref[0] = ga
    gb_ref[0] = gb
    # Per-(batch, band) partial of |grad_fused - max(grad_A, grad_B)|, broadcast into
    # one lane-aligned (8,128) tile; the wrapper sums element [0, 0] of each tile.
    part = jnp.sum(jnp.abs(gf - jnp.maximum(ga, gb)))
    lp_ref[0, 0] = jnp.full((8, 128), part, jnp.float32)


def _kth_mask_kernel(k_ref, ga_ref, gb_ref, ma_ref, mb_ref):
    """torch.kthvalue (k-th smallest over H*W) + '>= kth' mask, fused per batch.

    Gradients are non-negative f32, so their int32 bit patterns are order-preserving.
    An exact bitwise radix-select (31 count passes, sign bit is always 0) finds the
    k-th smallest bit pattern without any sort; the mask is written in the same pass.
    """
    k = k_ref[0]

    def kth_and_mask(g_ref, m_ref):
        u = pltpu.bitcast(g_ref[0].astype(jnp.float32), jnp.int32)   # (H, W)

        def body(i, carry):
            prefix, kk = carry
            bit = 30 - i
            mask = jnp.left_shift(jnp.int32(-1), bit)          # bits >= `bit` set
            cnt = jnp.sum(((u & mask) == prefix).astype(jnp.int32))
            go_one = cnt < kk                                  # kth element has bit=1
            prefix = jnp.where(go_one, prefix | jnp.left_shift(jnp.int32(1), bit), prefix)
            kk = jnp.where(go_one, kk - cnt, kk)
            return prefix, kk

        kth_bits, _ = lax.fori_loop(0, 31, body, (jnp.int32(0), k))
        m_ref[0] = (u >= kth_bits).astype(jnp.float32)

    kth_and_mask(ga_ref, ma_ref)
    kth_and_mask(gb_ref, mb_ref)


# ---------------------------------------------------------------------------
# Wrappers
# ---------------------------------------------------------------------------
def _vmem_budget():
    """(vmem_limit_bytes, max_band_bytes) tuned per TPU generation."""
    try:
        cap = int(getattr(pltpu.get_tpu_info(), "vmem_capacity_bytes", 0) or 0)
    except Exception:
        cap = 0
    if cap >= 96 * 1024 * 1024:                  # v5e / v6e: 128 MiB physical VMEM
        return 64 * 1024 * 1024, 2 * 1024 * 1024
    return 32 * 1024 * 1024, 1 * 1024 * 1024     # v7x (64 MiB / TC) or unknown


def _sublane(dtype):
    """Native sublane packing (rows per vreg): 8 for f32, 16 for bf16, 32 for int8."""
    return max(8, 32 // jnp.dtype(dtype).itemsize)


def _pick_tile_h(H, W, batch, sub, max_band_bytes):
    """Largest multiple-of-`sub` divisor of H whose f32 band fits max_band_bytes,
    preferring batch * n_bands >= 2 so both v7x TensorCores get work."""
    if H % sub != 0:
        return H            # fallback: single band (halo strips become full copies)
    divisors = [t for t in range(sub, H + 1, sub) if H % t == 0]
    fits = [t for t in divisors if t * W * 4 <= max_band_bytes] or [sub]
    best = max(fits)
    if batch * (H // best) < 2:
        multi = [t for t in fits if H // t >= 2]
        if multi:
            best = max(multi)
    return best


def _sobel_and_loss(image_A, image_B, image_fused, tile_h=None, *,
                    vmem_limit=32 * 1024 * 1024, max_band_bytes=1024 * 1024):
    """Sobel gradients of the Y channels of A/B plus the mean L1 gradient loss."""
    B, C, H, W = image_A.shape
    sub = _sublane(image_A.dtype)
    if tile_h is None:
        tile_h = _pick_tile_h(H, W, B, sub, max_band_bytes)
    if H % tile_h != 0 or (tile_h % sub != 0 and tile_h != H):
        raise ValueError(
            f"tile_h={tile_h} must divide H={H} and be a multiple of {sub} (or == H)")
    n_bands = H // tile_h
    strip_h = sub if tile_h % sub == 0 else tile_h   # halo strip height
    r = tile_h // strip_h                            # strips per band
    n_strips = H // strip_h

    # Main band of the Y channel (channel 0 selected by the BlockSpec -> no
    # wrapper-side slice/astype copy; narrow dtypes are upcast inside the kernel).
    main_spec = pl.BlockSpec((1, 1, tile_h, W), lambda b, i: (b, 0, i, 0))
    # Halo strips: the strip just above / below the band (clamped at the borders;
    # the kernel zero-masks the clamped rows to emulate conv zero padding).
    top_spec = pl.BlockSpec((1, 1, strip_h, W),
                            lambda b, i: (b, 0, jnp.maximum(i * r - 1, 0), 0))
    bot_spec = pl.BlockSpec((1, 1, strip_h, W),
                            lambda b, i: (b, 0, jnp.minimum((i + 1) * r, n_strips - 1), 0))
    grad_spec = pl.BlockSpec((1, tile_h, W), lambda b, i: (b, i, 0))
    loss_spec = pl.BlockSpec((1, 1, 8, 128), lambda b, i: (b, i, 0, 0))

    grad_a, grad_b, loss_part = pl.pallas_call(
        _sobel_loss_kernel,
        grid=(B, n_bands),
        in_specs=[main_spec, top_spec, bot_spec] * 3,
        out_specs=(grad_spec, grad_spec, loss_spec),
        out_shape=(
            jax.ShapeDtypeStruct((B, H, W), jnp.float32),
            jax.ShapeDtypeStruct((B, H, W), jnp.float32),
            jax.ShapeDtypeStruct((B, n_bands, 8, 128), jnp.float32),
        ),
        compiler_params=pltpu.CompilerParams(
            dimension_semantics=("parallel", "parallel"),
            vmem_limit_bytes=vmem_limit,
        ),
    )(image_A, image_A, image_A,
      image_B, image_B, image_B,
      image_fused, image_fused, image_fused)

    loss = jnp.sum(loss_part[:, :, 0, 0]) / (B * H * W)   # F.l1_loss reduction='mean'
    return grad_a, grad_b, loss


def _kth_masks(grad_a, grad_b, k, *, vmem_limit=32 * 1024 * 1024):
    """Per-batch k-th-smallest threshold masks for both gradient planes (one kernel)."""
    B, H, W = grad_a.shape
    g_spec = pl.BlockSpec((1, H, W), lambda b, k_ref: (b, 0, 0))
    mask_a, mask_b = pl.pallas_call(
        _kth_mask_kernel,
        grid_spec=pltpu.PrefetchScalarGridSpec(
            num_scalar_prefetch=1,
            grid=(B,),
            in_specs=[g_spec, g_spec],
            out_specs=(g_spec, g_spec),
        ),
        out_shape=(jax.ShapeDtypeStruct((B, H, W), jnp.float32),) * 2,
        compiler_params=pltpu.CompilerParams(
            dimension_semantics=("parallel",),
            vmem_limit_bytes=vmem_limit,
        ),
    )(jnp.full((1,), k, jnp.int32), grad_a, grad_b)
    return mask_a, mask_b


def l_grad(image_A, image_B, image_fused, thresholds, *, tile_h=None):
    """Forward pass of L_Grad.  NCHW inputs; returns (loss, mask_A, mask_B)."""
    B, C, H, W = image_A.shape
    k = int(thresholds)
    if not 1 <= k <= H * W:
        raise ValueError(f"thresholds={k} must lie in [1, H*W={H * W}] (torch.kthvalue)")

    vmem_limit, max_band_bytes = _vmem_budget()
    grad_a, grad_b, loss = _sobel_and_loss(
        image_A, image_B, image_fused, tile_h,
        vmem_limit=vmem_limit, max_band_bytes=max_band_bytes)
    # TODO(synk): for very large images the kth/mask kernel holds a full (H, W)
    # gradient plane per batch element in VMEM; tiling the count pass would be
    # needed beyond ~2k x 2k images.
    mask_a, mask_b = _kth_masks(grad_a, grad_b, k, vmem_limit=vmem_limit)
    return loss, mask_a.reshape(B, 1, H, W), mask_b.reshape(B, 1, H, W)


# ---------------------------------------------------------------------------
# Demo + self-check
# ---------------------------------------------------------------------------
def _ref_sobel(y):
    """Direct 3x3 cross-correlation reference (F.conv2d semantics, padding=1)."""
    _, H, W = y.shape
    yp = jnp.pad(y, ((0, 0), (1, 1), (1, 1)))
    kx = jnp.array(_SOBEL_X, jnp.float32)
    ky = jnp.array(_SOBEL_Y, jnp.float32)
    sx = sum(kx[di, dj] * yp[:, di:di + H, dj:dj + W]
             for di in range(3) for dj in range(3))
    sy = sum(ky[di, dj] * yp[:, di:di + H, dj:dj + W]
             for di in range(3) for dj in range(3))
    return jnp.abs(sx) + jnp.abs(sy)


def _check_one_config(B, C, H, W, k, tile_h):
    key = jax.random.PRNGKey(0)
    k_a, k_b, k_f = jax.random.split(key, 3)
    image_A = jax.random.uniform(k_a, (B, C, H, W), jnp.float32)
    image_B = jax.random.uniform(k_b, (B, C, H, W), jnp.float32)
    image_fused = jax.random.uniform(k_f, (B, C, H, W), jnp.float32)

    loss, mask_a, mask_b = l_grad(image_A, image_B, image_fused, k, tile_h=tile_h)
    jax.block_until_ready((loss, mask_a, mask_b))

    assert loss.shape == ()
    assert mask_a.shape == (B, 1, H, W) and mask_b.shape == (B, 1, H, W)

    # Pure-JAX reference check.
    a_y = image_A[:, 0].astype(jnp.float32)
    b_y = image_B[:, 0].astype(jnp.float32)
    f_y = image_fused[:, 0].astype(jnp.float32)
    ga_ref, gb_ref, gf_ref = _ref_sobel(a_y), _ref_sobel(b_y), _ref_sobel(f_y)
    loss_ref = jnp.mean(jnp.abs(gf_ref - jnp.maximum(ga_ref, gb_ref)))
    assert jnp.allclose(loss, loss_ref, rtol=1e-4, atol=1e-5)

    grad_a, grad_b, _ = _sobel_and_loss(image_A, image_B, image_fused, tile_h=tile_h)
    assert jnp.allclose(grad_a, ga_ref, rtol=1e-5, atol=1e-4)
    assert jnp.allclose(grad_b, gb_ref, rtol=1e-5, atol=1e-4)

    def ref_mask(g):
        flat = g.reshape(B, H * W)
        kth = jnp.sort(flat, axis=1)[:, k - 1]          # torch.kthvalue (k-th smallest)
        return (flat >= kth[:, None]).astype(jnp.float32).reshape(B, 1, H, W)

    # Masks built from the kernel's own gradients must match exactly (the bitwise
    # radix-select returns the exact k-th order statistic).
    assert jnp.array_equal(mask_a, ref_mask(grad_a))
    assert jnp.array_equal(mask_b, ref_mask(grad_b))


if __name__ == "__main__":
    # Lane-dense config (W multiple of 128), two row bands -> exercises the halo
    # strips, the sublane/lane rolls and the hoisted edge masks.
    _check_one_config(B=2, C=4, H=16, W=128, k=100, tile_h=8)
    # Small-W config -> exercises the unaligned-width concat fallback and the
    # automatic band picker (single band, zero-masked halos).
    _check_one_config(B=2, C=1, H=16, W=16, k=50, tile_h=None)
    print("KERNEL_OK")
</pallas_src>

<mosaic_0001>
module attributes {stable_mosaic.version = 11 : i64} {
  func.func @_sobel_loss_kernel(%arg0: i32, %arg1: i32, %arg2: memref<1x1x8x128xf32, #tpu.memory_space<vmem>>, %arg3: memref<1x1x8x128xf32, #tpu.memory_space<vmem>>, %arg4: memref<1x1x8x128xf32, #tpu.memory_space<vmem>>, %arg5: memref<1x1x8x128xf32, #tpu.memory_space<vmem>>, %arg6: memref<1x1x8x128xf32, #tpu.memory_space<vmem>>, %arg7: memref<1x1x8x128xf32, #tpu.memory_space<vmem>>, %arg8: memref<1x1x8x128xf32, #tpu.memory_space<vmem>>, %arg9: memref<1x1x8x128xf32, #tpu.memory_space<vmem>>, %arg10: memref<1x1x8x128xf32, #tpu.memory_space<vmem>>, %arg11: memref<1x8x128xf32, #tpu.memory_space<vmem>>, %arg12: memref<1x8x128xf32, #tpu.memory_space<vmem>>, %arg13: memref<1x1x8x128xf32, #tpu.memory_space<vmem>>) attributes {dimension_semantics = [#tpu.dimension_semantics<parallel>, #tpu.dimension_semantics<parallel>], iteration_bounds = array<i64: 2, 2>, scalar_prefetch = 0 : i64, scratch_operands = 0 : i64, tpu.core_type = #tpu.core_type<tc>, window_params = [{transform_indices = @transform_0, window_bounds = array<i64: 1, 1, 8, 128>}, {transform_indices = @transform_1, window_bounds = array<i64: 1, 1, 8, 128>}, {transform_indices = @transform_2, window_bounds = array<i64: 1, 1, 8, 128>}, {transform_indices = @transform_3, window_bounds = array<i64: 1, 1, 8, 128>}, {transform_indices = @transform_4, window_bounds = array<i64: 1, 1, 8, 128>}, {transform_indices = @transform_5, window_bounds = array<i64: 1, 1, 8, 128>}, {transform_indices = @transform_6, window_bounds = array<i64: 1, 1, 8, 128>}, {transform_indices = @transform_7, window_bounds = array<i64: 1, 1, 8, 128>}, {transform_indices = @transform_8, window_bounds = array<i64: 1, 1, 8, 128>}, {transform_indices = @transform_9, window_bounds = array<i64: 1, 8, 128>}, {transform_indices = @transform_10, window_bounds = array<i64: 1, 8, 128>}, {transform_indices = @transform_11, window_bounds = array<i64: 1, 1, 8, 128>}]} {
    %0 = tpu.iota {dimensions = array<i32: 1>} : vector<8x128xi32>
    %c0_i32 = arith.constant 0 : i32
    %1 = vector.broadcast %c0_i32 : i32 to vector<8x128xi32>
    %2 = arith.cmpi eq, %0, %1 : vector<8x128xi32>
    %c127_i32 = arith.constant 127 : i32
    %3 = vector.broadcast %c127_i32 : i32 to vector<8x128xi32>
    %4 = arith.cmpi eq, %0, %3 : vector<8x128xi32>
    %5 = tpu.iota {dimensions = array<i32: 0>} : vector<8x128xi32>
    %c0_i32_0 = arith.constant 0 : i32
    %6 = vector.broadcast %c0_i32_0 : i32 to vector<8x128xi32>
    %7 = arith.cmpi eq, %5, %6 : vector<8x128xi32>
    %c7_i32 = arith.constant 7 : i32
    %8 = vector.broadcast %c7_i32 : i32 to vector<8x128xi32>
    %9 = arith.cmpi eq, %5, %8 : vector<8x128xi32>
    %c0 = arith.constant 0 : index
    %c0_1 = arith.constant 0 : index
    %c0_2 = arith.constant 0 : index
    %c0_3 = arith.constant 0 : index
    %10 = vector.load %arg2[%c0, %c0_1, %c0_2, %c0_3] : memref<1x1x8x128xf32, #tpu.memory_space<vmem>>, vector<1x1x8x128xf32>
    %11 = vector.shape_cast %10 : vector<1x1x8x128xf32> to vector<8x128xf32>
    %c0_4 = arith.constant 0 : index
    %c0_5 = arith.constant 0 : index
    %c7 = arith.constant 7 : index
    %c0_6 = arith.constant 0 : index
    %12 = vector.load %arg3[%c0_4, %c0_5, %c7, %c0_6] : memref<1x1x8x128xf32, #tpu.memory_space<vmem>>, vector<1x1x1x128xf32>
    %13 = vector.shape_cast %12 : vector<1x1x1x128xf32> to vector<1x128xf32>
    %c0_7 = arith.constant 0 : index
    %c0_8 = arith.constant 0 : index
    %c0_9 = arith.constant 0 : index
    %c0_10 = arith.constant 0 : index
    %14 = vector.load %arg4[%c0_7, %c0_8, %c0_9, %c0_10] : memref<1x1x8x128xf32, #tpu.memory_space<vmem>>, vector<1x1x1x128xf32>
    %15 = vector.shape_cast %14 : vector<1x1x1x128xf32> to vector<1x128xf32>
    %c0_i32_11 = arith.constant 0 : i32
    %16 = arith.cmpi eq, %arg1, %c0_i32_11 : i32
    %cst = arith.constant 0.000000e+00 : f32
    %17 = vector.broadcast %cst : f32 to vector<1x128xf32>
    %18 = arith.select %16, %17, %13 : vector<1x128xf32>
    %c1_i32 = arith.constant 1 : i32
    %19 = arith.cmpi eq, %arg1, %c1_i32 : i32
    %cst_12 = arith.constant 0.000000e+00 : f32
    %20 = vector.broadcast %cst_12 : f32 to vector<1x128xf32>
    %21 = arith.select %19, %20, %15 : vector<1x128xf32>
    %c1_i32_13 = arith.constant 1 : i32
    %22 = tpu.dynamic_rotate %11 by %c1_i32_13 dim 0 : vector<8x128xf32>, i32 -> vector<8x128xf32>
    %23 = vector.shape_cast %18 : vector<1x128xf32> to vector<1x128xf32>
    %24 = vector.broadcast %23 : vector<1x128xf32> to vector<8x128xf32>
    %25 = arith.select %7, %24, %22 : vector<8x128xi1>, vector<8x128xf32>
    %c7_i32_14 = arith.constant 7 : i32
    %26 = tpu.dynamic_rotate %11 by %c7_i32_14 dim 0 : vector<8x128xf32>, i32 -> vector<8x128xf32>
    %27 = vector.shape_cast %21 : vector<1x128xf32> to vector<1x128xf32>
    %28 = vector.broadcast %27 : vector<1x128xf32> to vector<8x128xf32>
    %29 = arith.select %9, %28, %26 : vector<8x128xi1>, vector<8x128xf32>
    %cst_15 = arith.constant 2.000000e+00 : f32
    %30 = vector.broadcast %cst_15 : f32 to vector<8x128xf32>
    %31 = arith.mulf %30, %11 : vector<8x128xf32>
    %32 = arith.addf %25, %31 : vector<8x128xf32>
    %33 = arith.addf %32, %29 : vector<8x128xf32>
    %34 = arith.subf %25, %29 : vector<8x128xf32>
    %c127_i32_16 = arith.constant 127 : i32
    %35 = tpu.dynamic_rotate %33 by %c127_i32_16 dim 1 : vector<8x128xf32>, i32 -> vector<8x128xf32>
    %cst_17 = arith.constant 0.000000e+00 : f32
    %36 = vector.broadcast %cst_17 : f32 to vector<8x128xf32>
    %37 = arith.select %4, %36, %35 : vector<8x128xi1>, vector<8x128xf32>
    %c1_i32_18 = arith.constant 1 : i32
    %38 = tpu.dynamic_rotate %33 by %c1_i32_18 dim 1 : vector<8x128xf32>, i32 -> vector<8x128xf32>
    %cst_19 = arith.constant 0.000000e+00 : f32
    %39 = vector.broadcast %cst_19 : f32 to vector<8x128xf32>
    %40 = arith.select %2, %39, %38 : vector<8x128xi1>, vector<8x128xf32>
    %41 = arith.subf %37, %40 : vector<8x128xf32>
    %c1_i32_20 = arith.constant 1 : i32
    %42 = tpu.dynamic_rotate %34 by %c1_i32_20 dim 1 : vector<8x128xf32>, i32 -> vector<8x128xf32>
    %cst_21 = arith.constant 0.000000e+00 : f32
    %43 = vector.broadcast %cst_21 : f32 to vector<8x128xf32>
    %44 = arith.select %2, %43, %42 : vector<8x128xi1>, vector<8x128xf32>
    %cst_22 = arith.constant 2.000000e+00 : f32
    %45 = vector.broadcast %cst_22 : f32 to vector<8x128xf32>
    %46 = arith.mulf %45, %34 : vector<8x128xf32>
    %47 = arith.addf %44, %46 : vector<8x128xf32>
    %c127_i32_23 = arith.constant 127 : i32
    %48 = tpu.dynamic_rotate %34 by %c127_i32_23 dim 1 : vector<8x128xf32>, i32 -> vector<8x128xf32>
    %cst_24 = arith.constant 0.000000e+00 : f32
    %49 = vector.broadcast %cst_24 : f32 to vector<8x128xf32>
    %50 = arith.select %4, %49, %48 : vector<8x128xi1>, vector<8x128xf32>
    %51 = arith.addf %47, %50 : vector<8x128xf32>
    %52 = math.absf %41 : vector<8x128xf32>
    %53 = math.absf %51 : vector<8x128xf32>
    %54 = arith.addf %52, %53 : vector<8x128xf32>
    %c0_25 = arith.constant 0 : index
    %c0_26 = arith.constant 0 : index
    %c0_27 = arith.constant 0 : index
    %c0_28 = arith.constant 0 : index
    %55 = vector.load %arg5[%c0_25, %c0_26, %c0_27, %c0_28] : memref<1x1x8x128xf32, #tpu.memory_space<vmem>>, vector<1x1x8x128xf32>
    %56 = vector.shape_cast %55 : vector<1x1x8x128xf32> to vector<8x128xf32>
    %c0_29 = arith.constant 0 : index
    %c0_30 = arith.constant 0 : index
    %c7_31 = arith.constant 7 : index
    %c0_32 = arith.constant 0 : index
    %57 = vector.load %arg6[%c0_29, %c0_30, %c7_31, %c0_32] : memref<1x1x8x128xf32, #tpu.memory_space<vmem>>, vector<1x1x1x128xf32>
    %58 = vector.shape_cast %57 : vector<1x1x1x128xf32> to vector<1x128xf32>
    %c0_33 = arith.constant 0 : index
    %c0_34 = arith.constant 0 : index
    %c0_35 = arith.constant 0 : index
    %c0_36 = arith.constant 0 : index
    %59 = vector.load %arg7[%c0_33, %c0_34, %c0_35, %c0_36] : memref<1x1x8x128xf32, #tpu.memory_space<vmem>>, vector<1x1x1x128xf32>
    %60 = vector.shape_cast %59 : vector<1x1x1x128xf32> to vector<1x128xf32>
    %c0_i32_37 = arith.constant 0 : i32
    %61 = arith.cmpi eq, %arg1, %c0_i32_37 : i32
    %cst_38 = arith.constant 0.000000e+00 : f32
    %62 = vector.broadcast %cst_38 : f32 to vector<1x128xf32>
    %63 = arith.select %61, %62, %58 : vector<1x128xf32>
    %c1_i32_39 = arith.constant 1 : i32
    %64 = arith.cmpi eq, %arg1, %c1_i32_39 : i32
    %cst_40 = arith.constant 0.000000e+00 : f32
    %65 = vector.broadcast %cst_40 : f32 to vector<1x128xf32>
    %66 = arith.select %64, %65, %60 : vector<1x128xf32>
    %c1_i32_41 = arith.constant 1 : i32
    %67 = tpu.dynamic_rotate %56 by %c1_i32_41 dim 0 : vector<8x128xf32>, i32 -> vector<8x128xf32>
    %68 = vector.shape_cast %63 : vector<1x128xf32> to vector<1x128xf32>
    %69 = vector.broadcast %68 : vector<1x128xf32> to vector<8x128xf32>
    %70 = arith.select %7, %69, %67 : vector<8x128xi1>, vector<8x128xf32>
    %c7_i32_42 = arith.constant 7 : i32
    %71 = tpu.dynamic_rotate %56 by %c7_i32_42 dim 0 : vector<8x128xf32>, i32 -> vector<8x128xf32>
    %72 = vector.shape_cast %66 : vector<1x128xf32> to vector<1x128xf32>
    %73 = vector.broadcast %72 : vector<1x128xf32> to vector<8x128xf32>
    %74 = arith.select %9, %73, %71 : vector<8x128xi1>, vector<8x128xf32>
    %cst_43 = arith.constant 2.000000e+00 : f32
    %75 = vector.broadcast %cst_43 : f32 to vector<8x128xf32>
    %76 = arith.mulf %75, %56 : vector<8x128xf32>
    %77 = arith.addf %70, %76 : vector<8x128xf32>
    %78 = arith.addf %77, %74 : vector<8x128xf32>
    %79 = arith.subf %70, %74 : vector<8x128xf32>
    %c127_i32_44 = arith.constant 127 : i32
    %80 = tpu.dynamic_rotate %78 by %c127_i32_44 dim 1 : vector<8x128xf32>, i32 -> vector<8x128xf32>
    %cst_45 = arith.constant 0.000000e+00 : f32
    %81 = vector.broadcast %cst_45 : f32 to vector<8x128xf32>
    %82 = arith.select %4, %81, %80 : vector<8x128xi1>, vector<8x128xf32>
    %c1_i32_46 = arith.constant 1 : i32
    %83 = tpu.dynamic_rotate %78 by %c1_i32_46 dim 1 : vector<8x128xf32>, i32 -> vector<8x128xf32>
    %cst_47 = arith.constant 0.000000e+00 : f32
    %84 = vector.broadcast %cst_47 : f32 to vector<8x128xf32>
    %85 = arith.select %2, %84, %83 : vector<8x128xi1>, vector<8x128xf32>
    %86 = arith.subf %82, %85 : vector<8x128xf32>
    %c1_i32_48 = arith.constant 1 : i32
    %87 = tpu.dynamic_rotate %79 by %c1_i32_48 dim 1 : vector<8x128xf32>, i32 -> vector<8x128xf32>
    %cst_49 = arith.constant 0.000000e+00 : f32
    %88 = vector.broadcast %cst_49 : f32 to vector<8x128xf32>
    %89 = arith.select %2, %88, %87 : vector<8x128xi1>, vector<8x128xf32>
    %cst_50 = arith.constant 2.000000e+00 : f32
    %90 = vector.broadcast %cst_50 : f32 to vector<8x128xf32>
    %91 = arith.mulf %90, %79 : vector<8x128xf32>
    %92 = arith.addf %89, %91 : vector<8x128xf32>
    %c127_i32_51 = arith.constant 127 : i32
    %93 = tpu.dynamic_rotate %79 by %c127_i32_51 dim 1 : vector<8x128xf32>, i32 -> vector<8x128xf32>
    %cst_52 = arith.constant 0.000000e+00 : f32
    %94 = vector.broadcast %cst_52 : f32 to vector<8x128xf32>
    %95 = arith.select %4, %94, %93 : vector<8x128xi1>, vector<8x128xf32>
    %96 = arith.addf %92, %95 : vector<8x128xf32>
    %97 = math.absf %86 : vector<8x128xf32>
    %98 = math.absf %96 : vector<8x128xf32>
    %99 = arith.addf %97, %98 : vector<8x128xf32>
    %c0_53 = arith.constant 0 : index
    %c0_54 = arith.constant 0 : index
    %c0_55 = arith.constant 0 : index
    %c0_56 = arith.constant 0 : index
    %100 = vector.load %arg8[%c0_53, %c0_54, %c0_55, %c0_56] : memref<1x1x8x128xf32, #tpu.memory_space<vmem>>, vector<1x1x8x128xf32>
    %101 = vector.shape_cast %100 : vector<1x1x8x128xf32> to vector<8x128xf32>
    %c0_57 = arith.constant 0 : index
    %c0_58 = arith.constant 0 : index
    %c7_59 = arith.constant 7 : index
    %c0_60 = arith.constant 0 : index
    %102 = vector.load %arg9[%c0_57, %c0_58, %c7_59, %c0_60] : memref<1x1x8x128xf32, #tpu.memory_space<vmem>>, vector<1x1x1x128xf32>
    %103 = vector.shape_cast %102 : vector<1x1x1x128xf32> to vector<1x128xf32>
    %c0_61 = arith.constant 0 : index
    %c0_62 = arith.constant 0 : index
    %c0_63 = arith.constant 0 : index
    %c0_64 = arith.constant 0 : index
    %104 = vector.load %arg10[%c0_61, %c0_62, %c0_63, %c0_64] : memref<1x1x8x128xf32, #tpu.memory_space<vmem>>, vector<1x1x1x128xf32>
    %105 = vector.shape_cast %104 : vector<1x1x1x128xf32> to vector<1x128xf32>
    %c0_i32_65 = arith.constant 0 : i32
    %106 = arith.cmpi eq, %arg1, %c0_i32_65 : i32
    %cst_66 = arith.constant 0.000000e+00 : f32
    %107 = vector.broadcast %cst_66 : f32 to vector<1x128xf32>
    %108 = arith.select %106, %107, %103 : vector<1x128xf32>
    %c1_i32_67 = arith.constant 1 : i32
    %109 = arith.cmpi eq, %arg1, %c1_i32_67 : i32
    %cst_68 = arith.constant 0.000000e+00 : f32
    %110 = vector.broadcast %cst_68 : f32 to vector<1x128xf32>
    %111 = arith.select %109, %110, %105 : vector<1x128xf32>
    %c1_i32_69 = arith.constant 1 : i32
    %112 = tpu.dynamic_rotate %101 by %c1_i32_69 dim 0 : vector<8x128xf32>, i32 -> vector<8x128xf32>
    %113 = vector.shape_cast %108 : vector<1x128xf32> to vector<1x128xf32>
    %114 = vector.broadcast %113 : vector<1x128xf32> to vector<8x128xf32>
    %115 = arith.select %7, %114, %112 : vector<8x128xi1>, vector<8x128xf32>
    %c7_i32_70 = arith.constant 7 : i32
    %116 = tpu.dynamic_rotate %101 by %c7_i32_70 dim 0 : vector<8x128xf32>, i32 -> vector<8x128xf32>
    %117 = vector.shape_cast %111 : vector<1x128xf32> to vector<1x128xf32>
    %118 = vector.broadcast %117 : vector<1x128xf32> to vector<8x128xf32>
    %119 = arith.select %9, %118, %116 : vector<8x128xi1>, vector<8x128xf32>
    %cst_71 = arith.constant 2.000000e+00 : f32
    %120 = vector.broadcast %cst_71 : f32 to vector<8x128xf32>
    %121 = arith.mulf %120, %101 : vector<8x128xf32>
    %122 = arith.addf %115, %121 : vector<8x128xf32>
    %123 = arith.addf %122, %119 : vector<8x128xf32>
    %124 = arith.subf %115, %119 : vector<8x128xf32>
    %c127_i32_72 = arith.constant 127 : i32
    %125 = tpu.dynamic_rotate %123 by %c127_i32_72 dim 1 : vector<8x128xf32>, i32 -> vector<8x128xf32>
    %cst_73 = arith.constant 0.000000e+00 : f32
    %126 = vector.broadcast %cst_73 : f32 to vector<8x128xf32>
    %127 = arith.select %4, %126, %125 : vector<8x128xi1>, vector<8x128xf32>
    %c1_i32_74 = arith.constant 1 : i32
    %128 = tpu.dynamic_rotate %123 by %c1_i32_74 dim 1 : vector<8x128xf32>, i32 -> vector<8x128xf32>
    %cst_75 = arith.constant 0.000000e+00 : f32
    %129 = vector.broadcast %cst_75 : f32 to vector<8x128xf32>
    %130 = arith.select %2, %129, %128 : vector<8x128xi1>, vector<8x128xf32>
    %131 = arith.subf %127, %130 : vector<8x128xf32>
    %c1_i32_76 = arith.constant 1 : i32
    %132 = tpu.dynamic_rotate %124 by %c1_i32_76 dim 1 : vector<8x128xf32>, i32 -> vector<8x128xf32>
    %cst_77 = arith.constant 0.000000e+00 : f32
    %133 = vector.broadcast %cst_77 : f32 to vector<8x128xf32>
    %134 = arith.select %2, %133, %132 : vector<8x128xi1>, vector<8x128xf32>
    %cst_78 = arith.constant 2.000000e+00 : f32
    %135 = vector.broadcast %cst_78 : f32 to vector<8x128xf32>
    %136 = arith.mulf %135, %124 : vector<8x128xf32>
    %137 = arith.addf %134, %136 : vector<8x128xf32>
    %c127_i32_79 = arith.constant 127 : i32
    %138 = tpu.dynamic_rotate %124 by %c127_i32_79 dim 1 : vector<8x128xf32>, i32 -> vector<8x128xf32>
    %cst_80 = arith.constant 0.000000e+00 : f32
    %139 = vector.broadcast %cst_80 : f32 to vector<8x128xf32>
    %140 = arith.select %4, %139, %138 : vector<8x128xi1>, vector<8x128xf32>
    %141 = arith.addf %137, %140 : vector<8x128xf32>
    %142 = math.absf %131 : vector<8x128xf32>
    %143 = math.absf %141 : vector<8x128xf32>
    %144 = arith.addf %142, %143 : vector<8x128xf32>
    %c0_81 = arith.constant 0 : index
    %c0_82 = arith.constant 0 : index
    %c0_83 = arith.constant 0 : index
    %145 = vector.load %arg11[%c0_81, %c0_82, %c0_83] : memref<1x8x128xf32, #tpu.memory_space<vmem>>, vector<1x8x128xf32>
    %146 = vector.shape_cast %145 : vector<1x8x128xf32> to vector<8x128xf32>
    %147 = vector.shape_cast %54 : vector<8x128xf32> to vector<1x8x128xf32>
    tpu.vector_store %arg11[%c0_81, %c0_82, %c0_83], %147 {strides = array<i32>} : memref<1x8x128xf32, #tpu.memory_space<vmem>>, vector<1x8x128xf32>,
    %c0_84 = arith.constant 0 : index
    %c0_85 = arith.constant 0 : index
    %c0_86 = arith.constant 0 : index
    %148 = vector.load %arg12[%c0_84, %c0_85, %c0_86] : memref<1x8x128xf32, #tpu.memory_space<vmem>>, vector<1x8x128xf32>
    %149 = vector.shape_cast %148 : vector<1x8x128xf32> to vector<8x128xf32>
    %150 = vector.shape_cast %99 : vector<8x128xf32> to vector<1x8x128xf32>
    tpu.vector_store %arg12[%c0_84, %c0_85, %c0_86], %150 {strides = array<i32>} : memref<1x8x128xf32, #tpu.memory_space<vmem>>, vector<1x8x128xf32>,
    %151 = arith.maximumf %54, %99 : vector<8x128xf32>
    %152 = arith.subf %144, %151 : vector<8x128xf32>
    %153 = math.absf %152 : vector<8x128xf32>
    %154 = vector.shape_cast %153 : vector<8x128xf32> to vector<1x8x128xf32>
    %cst_87 = arith.constant dense<0.000000e+00> : vector<1xf32>
    %155 = vector.multi_reduction <add>, %154, %cst_87 [1, 2] : vector<1x8x128xf32> to vector<1xf32>
    %156 = vector.shape_cast %155 : vector<1xf32> to vector<1x1x1xf32>
    %157 = vector.extract %156[0, 0, 0] : f32 from vector<1x1x1xf32>
    %158 = vector.broadcast %157 : f32 to vector<8x128xf32>
    %c0_88 = arith.constant 0 : index
    %c0_89 = arith.constant 0 : index
    %c0_90 = arith.constant 0 : index
    %c0_91 = arith.constant 0 : index
    %159 = vector.load %arg13[%c0_88, %c0_89, %c0_90, %c0_91] : memref<1x1x8x128xf32, #tpu.memory_space<vmem>>, vector<1x1x8x128xf32>
    %160 = vector.shape_cast %159 : vector<1x1x8x128xf32> to vector<8x128xf32>
    %161 = vector.shape_cast %158 : vector<8x128xf32> to vector<1x1x8x128xf32>
    tpu.vector_store %arg13[%c0_88, %c0_89, %c0_90, %c0_91], %161 {strides = array<i32>} : memref<1x1x8x128xf32, #tpu.memory_space<vmem>>, vector<1x1x8x128xf32>,
    return
  }
  func.func @transform_0(%arg0: i32, %arg1: i32) -> (i32, i32, i32, i32) {
    %c0_i32 = arith.constant 0 : i32
    %c0_i32_0 = arith.constant 0 : i32
    %c0_i32_1 = arith.constant 0 : i32
    return %arg0, %c0_i32, %arg1, %c0_i32_0 : i32, i32, i32, i32
  }
  func.func @transform_1(%arg0: i32, %arg1: i32) -> (i32, i32, i32, i32) {
    %c1_i32 = arith.constant 1 : i32
    %0 = arith.muli %arg1, %c1_i32 : i32
    %c1_i32_0 = arith.constant 1 : i32
    %1 = arith.subi %0, %c1_i32_0 : i32
    %c0_i32 = arith.constant 0 : i32
    %2 = arith.maxsi %1, %c0_i32 : i32
    %c0_i32_1 = arith.constant 0 : i32
    %c0_i32_2 = arith.constant 0 : i32
    %c0_i32_3 = arith.constant 0 : i32
    return %arg0, %c0_i32_1, %2, %c0_i32_2 : i32, i32, i32, i32
  }
  func.func @transform_2(%arg0: i32, %arg1: i32) -> (i32, i32, i32, i32) {
    %c1_i32 = arith.constant 1 : i32
    %0 = arith.addi %arg1, %c1_i32 : i32
    %c1_i32_0 = arith.constant 1 : i32
    %1 = arith.muli %0, %c1_i32_0 : i32
    %c1_i32_1 = arith.constant 1 : i32
    %2 = arith.minsi %1, %c1_i32_1 : i32
    %c0_i32 = arith.constant 0 : i32
    %c0_i32_2 = arith.constant 0 : i32
    %c0_i32_3 = arith.constant 0 : i32
    return %arg0, %c0_i32, %2, %c0_i32_2 : i32, i32, i32, i32
  }
  func.func @transform_3(%arg0: i32, %arg1: i32) -> (i32, i32, i32, i32) {
    %c0_i32 = arith.constant 0 : i32
    %c0_i32_0 = arith.constant 0 : i32
    %c0_i32_1 = arith.constant 0 : i32
    return %arg0, %c0_i32, %arg1, %c0_i32_0 : i32, i32, i32, i32
  }
  func.func @transform_4(%arg0: i32, %arg1: i32) -> (i32, i32, i32, i32) {
    %c1_i32 = arith.constant 1 : i32
    %0 = arith.muli %arg1, %c1_i32 : i32
    %c1_i32_0 = arith.constant 1 : i32
    %1 = arith.subi %0, %c1_i32_0 : i32
    %c0_i32 = arith.constant 0 : i32
    %2 = arith.maxsi %1, %c0_i32 : i32
    %c0_i32_1 = arith.constant 0 : i32
    %c0_i32_2 = arith.constant 0 : i32
    %c0_i32_3 = arith.constant 0 : i32
    return %arg0, %c0_i32_1, %2, %c0_i32_2 : i32, i32, i32, i32
  }
  func.func @transform_5(%arg0: i32, %arg1: i32) -> (i32, i32, i32, i32) {
    %c1_i32 = arith.constant 1 : i32
    %0 = arith.addi %arg1, %c1_i32 : i32
    %c1_i32_0 = arith.constant 1 : i32
    %1 = arith.muli %0, %c1_i32_0 : i32
    %c1_i32_1 = arith.constant 1 : i32
    %2 = arith.minsi %1, %c1_i32_1 : i32
    %c0_i32 = arith.constant 0 : i32
    %c0_i32_2 = arith.constant 0 : i32
    %c0_i32_3 = arith.constant 0 : i32
    return %arg0, %c0_i32, %2, %c0_i32_2 : i32, i32, i32, i32
  }
  func.func @transform_6(%arg0: i32, %arg1: i32) -> (i32, i32, i32, i32) {
    %c0_i32 = arith.constant 0 : i32
    %c0_i32_0 = arith.constant 0 : i32
    %c0_i32_1 = arith.constant 0 : i32
    return %arg0, %c0_i32, %arg1, %c0_i32_0 : i32, i32, i32, i32
  }
  func.func @transform_7(%arg0: i32, %arg1: i32) -> (i32, i32, i32, i32) {
    %c1_i32 = arith.constant 1 : i32
    %0 = arith.muli %arg1, %c1_i32 : i32
    %c1_i32_0 = arith.constant 1 : i32
    %1 = arith.subi %0, %c1_i32_0 : i32
    %c0_i32 = arith.constant 0 : i32
    %2 = arith.maxsi %1, %c0_i32 : i32
    %c0_i32_1 = arith.constant 0 : i32
    %c0_i32_2 = arith.constant 0 : i32
    %c0_i32_3 = arith.constant 0 : i32
    return %arg0, %c0_i32_1, %2, %c0_i32_2 : i32, i32, i32, i32
  }
  func.func @transform_8(%arg0: i32, %arg1: i32) -> (i32, i32, i32, i32) {
    %c1_i32 = arith.constant 1 : i32
    %0 = arith.addi %arg1, %c1_i32 : i32
    %c1_i32_0 = arith.constant 1 : i32
    %1 = arith.muli %0, %c1_i32_0 : i32
    %c1_i32_1 = arith.constant 1 : i32
    %2 = arith.minsi %1, %c1_i32_1 : i32
    %c0_i32 = arith.constant 0 : i32
    %c0_i32_2 = arith.constant 0 : i32
    %c0_i32_3 = arith.constant 0 : i32
    return %arg0, %c0_i32, %2, %c0_i32_2 : i32, i32, i32, i32
  }
  func.func @transform_9(%arg0: i32, %arg1: i32) -> (i32, i32, i32) {
    %c0_i32 = arith.constant 0 : i32
    %c0_i32_0 = arith.constant 0 : i32
    return %arg0, %arg1, %c0_i32 : i32, i32, i32
  }
  func.func @transform_10(%arg0: i32, %arg1: i32) -> (i32, i32, i32) {
    %c0_i32 = arith.constant 0 : i32
    %c0_i32_0 = arith.constant 0 : i32
    return %arg0, %arg1, %c0_i32 : i32, i32, i32
  }
  func.func @transform_11(%arg0: i32, %arg1: i32) -> (i32, i32, i32, i32) {
    %c0_i32 = arith.constant 0 : i32
    %c0_i32_0 = arith.constant 0 : i32
    %c0_i32_1 = arith.constant 0 : i32
    return %arg0, %arg1, %c0_i32, %c0_i32_0 : i32, i32, i32, i32
  }
}

</mosaic_0001>

<bundles_post_ra>
// kernel: tpu_custom_call.1
= control target key start
LH: loop header
LB: loop body
LE: loop exit
PB: predicated region body
PF: predicated region fallthrough
CT: control target
= control target key end

     0   :  { %s2771_s0 = inlined_call_operand.hbm [shape: f32[2,4,16,128], index: 0, kind: input, shape index: {}]   ;;  %s2772_s1 = inlined_call_operand.hbm [shape: f32[2,4,16,128], index: 1, kind: input, shape index: {}]   ;;  %s2773_s2 = inlined_call_operand.hbm [shape: f32[2,4,16,128], index: 2, kind: input, shape index: {}]   ;;  %s2774_s3 = inlined_call_operand.hbm [shape: f32[2,4,16,128], index: 3, kind: input, shape index: {}]   ;;  %s2775_s4 = inlined_call_operand.hbm [shape: f32[2,4,16,128], index: 4, kind: input, shape index: {}]   ;;  %s2776_s5 = inlined_call_operand.hbm [shape: f32[2,4,16,128], index: 5, kind: input, shape index: {}]   ;;  %s2777_s6 = inlined_call_operand.hbm [shape: f32[2,4,16,128], index: 6, kind: input, shape index: {}]   ;;  %s2778_s7 = inlined_call_operand.hbm [shape: f32[2,4,16,128], index: 7, kind: input, shape index: {}]   ;;  %s2779_s8 = inlined_call_operand.hbm [shape: f32[2,4,16,128], index: 8, kind: input, shape index: {}]   ;;  %s2780_s9 = inlined_call_operand.hbm [shape: f32[2,16,128], index: 9, kind: output, shape index: {0}]   ;;  %s2781_s10 = inlined_call_operand.hbm [shape: f32[2,16,128], index: 10, kind: output, shape index: {1}]   ;;  %s2782_s11 = inlined_call_operand.hbm [shape: f32[2,2,8,128], index: 11, kind: output, shape index: {2}]  }
   0x1   :  { %2819 = sst [smem:[#allocation52_spill]] %s2771_s0 }
   0x2   :  { %2820 = sst [smem:[#allocation53_spill]] %s2772_s1 }
   0x3   :  { %2821 = sst [smem:[#allocation54_spill]] %s2773_s2 }
   0x4   :  { %2822 = sst [smem:[#allocation55_spill]] %s2774_s3 }
   0x5   :  { %2823 = sst [smem:[#allocation56_spill]] %s2775_s4 }
   0x6   :  { %2824 = sst [smem:[#allocation57_spill]] %s2776_s5 }
   0x7   :  { %2825 = sst [smem:[#allocation58_spill]] %s2777_s6 }
   0x8   :  { %2826 = sst [smem:[#allocation59_spill]] %s2778_s7 }
   0x9   :  { %2827 = sst [smem:[#allocation60_spill]] %s2779_s8 }
   0xa   :  { %2828 = sst [smem:[#allocation61_spill]] %s2780_s9 }
   0xb   :  { %2829 = sst [smem:[#allocation62_spill]] %s2781_s10 }
   0xc   :  { %2830 = sst [smem:[#allocation63_spill]] %s2782_s11 }
   0xd   :  { %17 = vsyncpa [#allocation3], 0 }
   0xe   :  { %19 = vsyncpa [#allocation3 + $0x1], 0 }
   0xf   :  { %20 = vsyncpa [#allocation6], 0 }
  0x10   :  { %22 = vsyncpa [#allocation6 + $0x1], 0 }
  0x11   :  { %23 = vsyncpa [#allocation9], 0 }
  0x12   :  { %25 = vsyncpa [#allocation9 + $0x1], 0 }
  0x13   :  { %26 = vsyncpa [#allocation12], 0 }
  0x14   :  { %28 = vsyncpa [#allocation12 + $0x1], 0 }
  0x15   :  { %29 = vsyncpa [#allocation15], 0 }
  0x16   :  { %31 = vsyncpa [#allocation15 + $0x1], 0 }
  0x17   :  { %32 = vsyncpa [#allocation4], 0 }
  0x18   :  { %34 = vsyncpa [#allocation4 + $0x1], 0 }
  0x19   :  { %35 = vsyncpa [#allocation19], 0 }
  0x1a   :  { %37 = vsyncpa [#allocation19 + $0x1], 0  ;;  %s2202_s17 = smov 0   ;;  %s2204_s18 = smov 0  }
  0x1b   :  { %s2206_s19 = smov 0   ;;  %s2208_s20 = smov 0  }
  0x1c   :  { %s2210_s21 = smov 0   ;;  %s2212_s22 = smov 0  }
  0x1d   :  { %s2214_s23 = smov 0   ;;  %s2216_s24 = smov 0  }
  0x1e   :  { %s2218_s25 = smov 0   ;;  %s2220_s26 = smov 0  }
  0x1f   :  { %s2222_s27 = smov 0   ;;  %s2224_s28 = smov 0  }
  0x20   :  { %s2226_s29 = smov 0   ;;  %s2228_s30 = smov 0  }
  0x21 LB: > { %2831 = sst [smem:[#allocation32_spill]] %s2090_s18  ;;  %s2271_s12 = sadd.s32 4294967295, %s2138_s30   ;;  %s2138_s30 = sphi %s2228_s30, %s43_s30   ;;  %s2134_s29 = sphi %s2226_s29, %s2920_s29   ;;  %s2130_s28 = sphi %s2224_s28, %s2915_s28   ;;  %s2126_s27 = sphi %s2222_s27, %s2914_s27   ;;  %s2122_s26 = sphi %s2220_s26, %s2913_s26   ;;  %s2118_s25 = sphi %s2218_s25, %s2912_s25   ;;  %s2114_s24 = sphi %s2216_s24, %s2919_s24   ;;  %s2110_s23 = sphi %s2214_s23, %s2918_s23   ;;  %s2106_s22 = sphi %s2212_s22, %s2910_s22   ;;  %s2102_s21 = sphi %s2210_s21, %s2909_s21   ;;  %s2098_s20 = sphi %s2208_s20, %s2908_s20   ;;  %s2094_s19 = sphi %s2206_s19, %s2907_s19   ;;  %s2090_s18 = sphi %s2204_s18, %s2906_s18   ;;  %s2086_s17 = sphi %s2202_s17, %s2905_s17  }
  0x22   : > { %2832 = sst [smem:[#allocation33_spill]] %s2094_s19  ;;  %s52_s13 = sadd.s32 1, %s2130_s28 }
  0x23   : > { %2833 = sst [smem:[#allocation34_spill]] %s2102_s21  ;;  %p53_p0 = scmp.ge.s32.totalorder %s52_s13, 2 }
  0x24   : > { %2834 = sst [smem:[#allocation35_spill]] %s2106_s22  ;;  %s55_s14 = sadd.s32 1, %s2134_s29 }
  0x25   : > { %2835 = sst [smem:[#allocation36_spill]] %s2110_s23  ;;  %p72_p1 = scmp.eq.s32.totalorder %s2138_s30, 0 }
  0x26   : > { %2836 = sst [smem:[#allocation37_spill]] %s2118_s25  ;;  %p2795_p2 = scmp.eq.s32.totalorder %s2271_s12, 0 }
  0x27   : > { %2837 = sst [smem:[#allocation38_spill]] %s2122_s26  ;;  %s2922_s13 = smov (%p53_p0, %s52_s13), 0 }
  0x28   : > { %2838 = sst [smem:[#allocation39_spill]] %s2126_s27  ;;  %s2924_s14 = smov (!%p53_p0, %s55_s14), %s2134_s29 }
  0x29   : > { %2839 = sst [smem:[#allocation40_spill]] %s2130_s28  ;;  %s60_s15 = ssub.s32 %s2130_s28, %s2922_s13 }
  0x2a   : > { %2840 = sst [smem:[#allocation41_spill]] %s2134_s29  ;;  %p57_p3 = scmp.ge.s32.totalorder %s2924_s14, 2 }
  0x2b   : > { %2841 = sst [smem:[#allocation42_spill]] %s2138_s30  ;;  %s98_s16 = sadd.s32 1, %s2106_s22 }
  0x2c   : > { %2842 = sst [smem:[#allocation43_spill]] %s2922_s13  ;;  %s2926_s14 = smov (%p57_p3, %s2924_s14), 0 }
  0x2d   : > { %2843 = sst [smem:[#allocation44_spill]] %s2926_s14  ;;  %s2287_s11 = ssub.s32 %s2134_s29, %s2926_s14 }
  0x2e   : > { %s2290_s9 = sor.u32 %s60_s15, %s2287_s11  ;;  %p105_p4 = scmp.ne.s32.totalorder %s2106_s22, %s2102_s21 }
  0x2f   : > { %p62_p5 = scmp.eq.s32.totalorder %s2290_s9, 0  ;;  %p111_p6 = scmp.ne.s32.totalorder %s2102_s21, %s2098_s20 }
  0x30   : > { %p2298_p7 = por %p105_p4, %p72_p1  ;;  %p2794_p9 = scmp.lt.s32.totalorder %s2138_s30, 4 }
  0x31   : > { %p2304_p8 = por %p111_p6, %p2795_p2  ;;  %p2793_p10 = scmp.eq.s32.totalorder %s2287_s11, 0 }
  0x32   : > { %s2312_s10 = sand.u32 1, %s2138_s30   ;;  %s468_s20 = sand.u32 1, %s2106_s22  }
  0x33   : > { %s2845_s14 = scalar_select %p2304_p8, 1, 0 }
  0x34   : > { %s2318_s27 = scalar_select %p2793_p10, %s2106_s22, %s98_s16  }
  0x35   : > { %2846 = sst [smem:[#allocation45_spill]] %s2845_s14  ;;  %s2320_s26 = sshll.u32 %s468_s20, 3 }
  0x36   : > { %2847 = sst [smem:[#allocation46_spill]] %s2318_s27  ;;  %s2323_s21 = sshll.u32 %s2134_s29, 6 }
  0x37   : > { %s470_s8 = scalar_lea.vmem [#allocation5], %s2320_s26  ;;  %s2848_s1 = sld [smem:[#allocation53_spill]] }
  0x38   : > { %s483_s14 = sshll.u32 %s470_s8, 4  ;;  %p2334_p11 = pnand %p2794_p9, %p2298_p7  ;;  %s484_s14 = int_to_ptr.vmem [resolvable:$true] %s483_s14 }
  0x39   : > { %p1422_p12 = scmp.ge.s32.totalorder %s2138_s30, 1  ;;  %p650_p13 = scmp.lt.s32.totalorder %s2138_s30, 5 }
  0x3a   : > { %s2797_s16 = scalar_lea.sflag [#allocation6], %s2312_s10  ;;  %p2802_p3 = pneg %p2334_p11 }
  0x3d   : > { %s479_s2 = scalar_lea.hbm %s2848_s1, %s2323_s21  ;;  %s1633_s6 = scalar_lea.hbm %s2848_s1, 128 }
  0x3e   : > { %s481_s15 = sshll.u32 %s479_s2, 4  ;;  %s482_s15 = int_to_ptr.hbm [resolvable:$true] %s481_s15 }
  0x3f   : > { %s1626_s20 = sshra.s32 %s482_s15, 4  ;;  %s1627_s20 = int_to_ptr.hbm [resolvable:$true] %s1626_s20 }
  0x40   : > { %s1628_s8 = scalar_lea.hbm %s1627_s20, 8  ;;  %p1634_p7 = scmp.lt.s32.totalorder %s1627_s20, %s2848_s1 }
  0x41   : > { %p1629_p0 = scmp.ne.s32.totalorder %s1627_s20, %s1628_s8  ;;  %p1635_p10 = scmp.lt.s32.totalorder %s1633_s6, %s1628_s8 }
  0x43   : > { %p1631_p4 = pnand %p2802_p3, %p1629_p0  ;;  %p1636_p9 = por %p1635_p10, %p1634_p7 }
  0x45   : > { %p1632_p6 = pneg %p1631_p4 }
  0x47   : > { %p1637_p2 = pnand %p1636_p9, %p1632_p6 }
  0x49   : > { %1640 = shalt.err (!%p1637_p2)
}
  0x4a   : > { %1478 = dma.hbm_to_vmem [thread:$0]  (!%p2334_p11), %s482_s15, 128, %s484_s14, %s2797_s16  }
  0x4b   : > { %p2360_p2 = pnand %p1422_p12, %p650_p13  ;;  %s2796_s20 = sadd.s32 4294967294, %s2138_s30  }
  0x4c   : > { %s64_s8 = sadd.s32 1, %s2118_s25  ;;  %p71_p9 = scmp.ne.s32.totalorder %s2118_s25, %s2114_s24 }
  0x4d   : > { %s2371_s2 = scalar_select %p62_p5, %s2118_s25, %s64_s8  }
  0x4e   : > { %p73_p10 = por %p72_p1, %p71_p9  ;;  %p77_p0 = scmp.ne.s32.totalorder %s2114_s24, %s2110_s23 }
  0x4f   : > { %2851 = sst [smem:[#allocation47_spill]] %s2371_s2  ;;  %p363_p4 = scmp.eq.s32.totalorder %s2271_s12, 3 }
  0x50   : > { %p369_p6 = scmp.eq.s32.totalorder %s2796_s20, 3  ;;  %p2852_p7 = scmp.eq.s32.totalorder %s2271_s12, 0 }
  0x51   : > { %s2798_s15 = sand.u32 1, %s2118_s25   ;;  %p2387_p13 = por %p363_p4, %p71_p9 }
  0x52   : > { %p2382_p12 = por %p2852_p7, %p77_p0  ;;  %p2391_p5 = por %p369_p6, %p77_p0 }
  0x53   : > { %s2854_s9 = scalar_select %p2387_p13, 1, 0 }
  0x54   : > { %s2856_s4 = scalar_select %p2391_p5, 1, 0 }
  0x55   : > { %2855 = sst [smem:[#allocation48_spill]] %s2854_s9  ;;  %s2397_s6 = sshll.u32 %s2798_s15, 3 }
  0x56   : > { %2857 = sst [smem:[#allocation49_spill]] %s2856_s4  ;;  %s2858_s13 = sshll.u32 %s2134_s29, 3 }
  0x57   : > { %s453_s8 = sadd.s32 %s2130_s28, %s2858_s13  ;;  %p2859_p9 = scmp.lt.s32.totalorder %s2138_s30, 4 }
  0x58   : > { %s2402_s20 = sshll.u32 %s453_s8, 3  ;;  %s2861_s3 = sld [smem:[#allocation55_spill]] }
  0x59   : > { %p2406_p4 = pnand %p2859_p9, %p73_p10  ;;  %s518_s13 = scalar_lea.vmem [#allocation8], %s2397_s6 }
  0x5a   : > { %s528_s28 = sshll.u32 %s518_s13, 4  ;;  %s2804_s8 = scalar_lea.sflag [#allocation9], %s2312_s10  ;;  %s529_s28 = int_to_ptr.vmem [resolvable:$true] %s528_s28 }
  0x5b   : > { %s132_s22 = sadd.s32 1, %s2094_s19  ;;  %p139_p10 = scmp.ne.s32.totalorder %s2094_s19, %s2090_s18 }
  0x5c   : > { %p145_p0 = scmp.ne.s32.totalorder %s2090_s18, %s2086_s17  ;;  %s492_s1 = sand.u32 1, %s2094_s19  }
  0x5d   : > { %p141_p6 = por %p139_p10, %p72_p1  ;;  %p2864_p3 = scmp.eq.s32.totalorder %s2287_s11, 0 }
  0x5e   : > { %s524_s15 = scalar_lea.hbm %s2861_s3, %s2402_s20  ;;  %p2430_p9 = por %p145_p0, %p2852_p7 }
  0x5f   : > { %s526_s29 = sshll.u32 %s524_s15, 4  ;;  %s2434_s15 = sshll.u32 %s492_s1, 3  ;;  %s527_s29 = int_to_ptr.hbm [resolvable:$true] %s526_s29 }
  0x60   : > { %1484 = dma.hbm_to_vmem [thread:$0]  (!%p2406_p4), %s527_s29, 128, %s529_s28, %s2804_s8  }
  0x61   : > { %s2862_s2 = scalar_select %p2430_p9, 1, 0 }
  0x62   : > { %s2439_s28 = scalar_select %p2864_p3, %s2094_s19, %s132_s22  }
  0x63   : > { %2863 = sst [smem:[#allocation50_spill]] %s2862_s2  ;;  %s2442_s29 = sadd.s32 8, %s2323_s21 }
  0x64   : > { %2865 = sst [smem:[#allocation51_spill]] %s2439_s28  ;;  %p2866_p5 = scmp.lt.s32.totalorder %s2138_s30, 4 }
  0x65   : > { %s2868_s5 = sld [smem:[#allocation57_spill]]  ;;  %s563_s4 = scalar_lea.vmem [#allocation11], %s2434_s15 }
  0x66   : > { %p2446_p13 = pnand %p2866_p5, %p141_p6  ;;  %s576_s11 = sshll.u32 %s563_s4, 4  ;;  %s577_s11 = int_to_ptr.vmem [resolvable:$true] %s576_s11 }
  0x67   : > { %s2815_s22 = scalar_lea.sflag [#allocation12], %s2312_s10  ;;  %s2869_s7 = sld [smem:[#allocation59_spill]] }
  0x68   : > { %s608_s30 = scalar_lea.vmem [#allocation14], %s2320_s26  ;;  %s2817_s8 = scalar_lea.sflag [#allocation15], %s2312_s10 }
  0x69   : > { %s621_s9 = sshll.u32 %s608_s30, 4  ;;  %p2870_p3 = pneg %p2334_p11  ;;  %s622_s9 = int_to_ptr.vmem [resolvable:$true] %s621_s9 }
  0x6b   : > { %s572_s3 = scalar_lea.hbm %s2868_s5, %s2442_s29 }
  0x6c   : > { %s574_s1 = sshll.u32 %s572_s3, 4  ;;  %s575_s1 = int_to_ptr.hbm [resolvable:$true] %s574_s1 }
  0x6d   : > { %1490 = dma.hbm_to_vmem [thread:$0]  (!%p2446_p13), %s575_s1, 128, %s577_s11, %s2815_s22  }
  0x6e   : > { %s617_s23 = scalar_lea.hbm %s2869_s7, %s2323_s21  ;;  %s1723_s11 = scalar_lea.hbm %s2869_s7, 128 }
  0x6f   : > { %s619_s2 = sshll.u32 %s617_s23, 4  ;;  %s620_s2 = int_to_ptr.hbm [resolvable:$true] %s619_s2 }
  0x70   : > { %s1716_s3 = sshra.s32 %s620_s2, 4  ;;  %s1717_s3 = int_to_ptr.hbm [resolvable:$true] %s1716_s3 }
  0x71   : > { %s1718_s4 = scalar_lea.hbm %s1717_s3, 8  ;;  %p1724_p0 = scmp.lt.s32.totalorder %s1717_s3, %s2869_s7 }
  0x72   : > { %p1719_p1 = scmp.ne.s32.totalorder %s1717_s3, %s1718_s4  ;;  %p1725_p6 = scmp.lt.s32.totalorder %s1723_s11, %s1718_s4 }
  0x74   : > { %p1721_p5 = pnand %p1719_p1, %p2870_p3  ;;  %p1726_p7 = por %p1725_p6, %p1724_p0 }
  0x76   : > { %p1722_p10 = pneg %p1721_p5 }
  0x78   : > { %p1727_p9 = pnand %p1726_p7, %p1722_p10 }
  0x7a   : > { %1730 = shalt.err (!%p1727_p9)
}
  0x7b   : > { %1496 = dma.hbm_to_vmem [thread:$0]  (!%p2334_p11), %s620_s2, 128, %s622_s9, %s2817_s8  }
  0x7c   : > { %s2871_s3 = sld [smem:[#allocation52_spill]]  ;;  %s449_s1 = scalar_lea.vmem [#allocation2], %s2397_s6 }
  0x7d   : > { %s459_s11 = sshll.u32 %s449_s1, 4  ;;  %s2872_s19 = sand.u32 1, %s2118_s25   ;;  %s460_s11 = int_to_ptr.vmem [resolvable:$true] %s459_s11 }
  0x7e   : > { %s446_s28 = scalar_lea.sflag [#allocation3], %s2872_s19  ;;  %s2873_s7 = sld [smem:[#allocation54_spill]] }
  0x7f   : > { %s494_s2 = scalar_lea.vmem [#allocation7], %s2434_s15  ;;  %s2874_s30 = scalar_lea.sflag [#allocation6], %s2312_s10 }
  0x80   : > { %s507_s23 = sshll.u32 %s494_s2, 4  ;;  %s2875_s1 = sld [smem:[#allocation56_spill]]  ;;  %s508_s23 = int_to_ptr.vmem [resolvable:$true] %s507_s23 }
  0x81   : > { %s539_s25 = scalar_lea.vmem [#allocation10], %s2320_s26  ;;  %p2876_p1 = pmov %p2870_p3 }
  0x82   : > { %s455_s4 = scalar_lea.hbm %s2871_s3, %s2402_s20 }
  0x83   : > { %s457_s13 = sshll.u32 %s455_s4, 4  ;;  %s458_s13 = int_to_ptr.hbm [resolvable:$true] %s457_s13 }
  0x84   : > { %1475 = dma.hbm_to_vmem [thread:$0]  (!%p2406_p4), %s458_s13, 128, %s460_s11, %s446_s28  }
  0x85   : > { %s503_s18 = scalar_lea.hbm %s2873_s7, %s2442_s29  ;;  %s552_s13 = sshll.u32 %s539_s25, 4  ;;  %s553_s13 = int_to_ptr.vmem [resolvable:$true] %s552_s13 }
  0x86   : > { %s505_s9 = sshll.u32 %s503_s18, 4  ;;  %s548_s8 = scalar_lea.hbm %s2875_s1, %s2323_s21  ;;  %s506_s9 = int_to_ptr.hbm [resolvable:$true] %s505_s9 }
  0x87   : > { %1481 = dma.hbm_to_vmem [thread:$0]  (!%p2446_p13), %s506_s9, 128, %s508_s23, %s2874_s30  }
  0x88   : > { %s550_s19 = sshll.u32 %s548_s8, 4  ;;  %s1813_s11 = scalar_lea.hbm %s2875_s1, 128  ;;  %s551_s19 = int_to_ptr.hbm [resolvable:$true] %s550_s19 }
  0x89   : > { %s1806_s5 = sshra.s32 %s551_s19, 4  ;;  %s1807_s5 = int_to_ptr.hbm [resolvable:$true] %s1806_s5 }
  0x8a   : > { %s1808_s7 = scalar_lea.hbm %s1807_s5, 8  ;;  %p1814_p10 = scmp.lt.s32.totalorder %s1807_s5, %s2875_s1 }
  0x8b   : > { %p1809_p9 = scmp.ne.s32.totalorder %s1807_s5, %s1808_s7  ;;  %p1815_p0 = scmp.lt.s32.totalorder %s1813_s11, %s1808_s7 }
  0x8d   : > { %p1811_p3 = pnand %p1809_p9, %p2876_p1  ;;  %p1816_p6 = por %p1815_p0, %p1814_p10 }
  0x8f   : > { %p1812_p5 = pneg %p1811_p3 }
  0x91   : > { %p1817_p7 = pnand %p1816_p6, %p1812_p5 }
  0x93   : > { %1820 = shalt.err (!%p1817_p7)
}
  0x94   : > { %s2877_s21 = scalar_lea.sflag [#allocation9], %s2312_s10  ;;  %s2878_s8 = sld [smem:[#allocation58_spill]] }
  0x95   : > { %1487 = dma.hbm_to_vmem [thread:$0]  (!%p2334_p11), %s551_s19, 128, %s553_s13, %s2877_s21  }
  0x96   : > { %s587_s30 = scalar_lea.vmem [#allocation13], %s2397_s6  ;;  %s2879_s0 = scalar_lea.sflag [#allocation12], %s2312_s10 }
  0x97   : > { %s597_s3 = sshll.u32 %s587_s30, 4  ;;  %s2880_s7 = sld [smem:[#allocation60_spill]]  ;;  %s598_s3 = int_to_ptr.vmem [resolvable:$true] %s597_s3 }
  0x98   : > { %s632_s11 = scalar_lea.vmem [#allocation16], %s2434_s15  ;;  %s2881_s19 = scalar_lea.sflag [#allocation15], %s2312_s10 }
  0x99   : > { %s645_s28 = sshll.u32 %s632_s11, 4  ;;  %s2536_s16 = sand.u32 (!%p2360_p2), 1, %s2114_s24   ;;  %s646_s28 = int_to_ptr.vmem [resolvable:$true] %s645_s28 }
  0x9a   : > { %s593_s2 = scalar_lea.hbm %s2878_s8, %s2402_s20  ;;  %s2539_s20 = sshll.u32 (!%p2360_p2), %s2536_s16, 3 }
  0x9b   : > { %s595_s23 = sshll.u32 %s593_s2, 4  ;;  %654 = sbr.rel (%p2360_p2) target bundleno = 544 (0x220), region = 56  ;;  %s596_s23 = int_to_ptr.hbm [resolvable:$true] %s595_s23 }
  0x9c   : > { %1493 = dma.hbm_to_vmem [thread:$0]  (!%p2406_p4), %s596_s23, 128, %s598_s3, %s2879_s0  }
  0x9d   : > { %s641_s18 = scalar_lea.hbm %s2880_s7, %s2442_s29  ;;  %s657_s6 = scalar_lea.sflag (!%p2360_p2), [#allocation3], %s2536_s16 }
  0x9e   : > { %s643_s22 = sshll.u32 %s641_s18, 4  ;;  %s660_s15 = scalar_lea.vmem (!%p2360_p2), [#allocation2], %s2539_s20  ;;  %s644_s22 = int_to_ptr.hbm [resolvable:$true] %s643_s22 }
  0x9f   : > { %1499 = dma.hbm_to_vmem [thread:$0]  (!%p2446_p13), %s644_s22, 128, %s646_s28, %s2881_s19  }
  0xa0   : > { %2037 = dma.done.wait (%p2382_p12), %s657_s6, 128  }
  0xa1   : > { %2039 = vsyncadd (%p2382_p12), %s657_s6, 4294967168  ;;  %s2882_s10 = sld [smem:[#allocation34_spill]]  ;;  %s2548_s29 = sand.u32 1, %s2271_s12  }
  0xa2   : > { %s667_s9 = scalar_lea.sflag [#allocation6], %s2548_s29 }
  0xa7   : > { %s668_s17 = sand.u32 1, %s2882_s10  }
  0xa8   : > { %s2551_s13 = sshll.u32 %s668_s17, 3 }
  0xa9   : > { %s670_s21 = scalar_lea.vmem [#allocation5], %s2551_s13 }
  0xaa   : > { %2041 = dma.done.wait (%p2304_p8), %s667_s9, 128  }
  0xab   : > { %2043 = vsyncadd (%p2304_p8), %s667_s9, 4294967168  ;;  %s2884_s25 = sld [smem:[#allocation32_spill]] }
  0xac   : > { %s2885_s26 = sld [smem:[#allocation50_spill]] }
  0xb1   : > { %s678_s8 = sand.u32 1, %s2884_s25  }
  0xb2   : > { %s2560_s2 = sshll.u32 %s678_s8, 3  ;;  %p2886_p11 = scmp.ne.s32.totalorder %s2885_s26, 0 }
  0xb3   : > { %s680_s12 = scalar_lea.vmem [#allocation7], %s2560_s2 }
  0xb4   : > { %2045 = dma.done.wait (%p2886_p11), %s667_s9, 128  }
  0xb5   : > { %2047 = vsyncadd (%p2886_p11), %s667_s9, 4294967168  ;;  %s687_s23 = scalar_lea.sflag [#allocation9], %s2548_s29  ;;  %s690_s30 = scalar_lea.vmem [#allocation8], %s2539_s20 }
  0xb6   : > { %2049 = dma.done.wait (%p2382_p12), %s687_s23, 128  }
  0xb7   : > { %2051 = vsyncadd (%p2382_p12), %s687_s23, 4294967168  ;;  %s700_s3 = scalar_lea.vmem [#allocation10], %s2551_s13 }
  0xb8   : > { %2053 = dma.done.wait (%p2304_p8), %s687_s23, 128  }
  0xb9   : > { %2055 = vsyncadd (%p2304_p8), %s687_s23, 4294967168  ;;  %s707_s0 = scalar_lea.sflag [#allocation12], %s2548_s29  ;;  %s710_s4 = scalar_lea.vmem [#allocation11], %s2560_s2 }
  0xba   : > { %2057 = dma.done.wait (%p2886_p11), %s707_s0, 128  }
  0xbb   : > { %2059 = vsyncadd (%p2886_p11), %s707_s0, 4294967168  ;;  %s720_s5 = scalar_lea.vmem [#allocation13], %s2539_s20 }
  0xbc   : > { %2061 = dma.done.wait (%p2382_p12), %s707_s0, 128  }
  0xbd   : > { %2063 = vsyncadd (%p2382_p12), %s707_s0, 4294967168  ;;  %s727_s7 = scalar_lea.sflag [#allocation15], %s2548_s29  ;;  %s730_s18 = scalar_lea.vmem [#allocation14], %s2551_s13 }
  0xbe   : > { %2065 = dma.done.wait (%p2304_p8), %s727_s7, 128  }
  0xbf   : > { %2067 = vsyncadd (%p2304_p8), %s727_s7, 4294967168  ;;  %s740_s22 = scalar_lea.vmem [#allocation16], %s2560_s2 }
  0xc0   : > { %2069 = dma.done.wait (%p2886_p11), %s727_s7, 128  }
  0xc1   : > { %2071 = vsyncadd (%p2886_p11), %s727_s7, 4294967168  ;;  %s2887_s14 = sld [smem:[#allocation38_spill]]  ;;  %v848_v0 = vlaneseq  ;;  %v898_v6 = vld [vmem:[%s690_s30] sm:$0xff]  ;;  %v899_v7 = vld [vmem:[%s700_s3 + $0x7] sm:$0x1]  ;;  %s2140_s19 = smov 127  }
  0xc2   : > { %v900_v8 = vld [vmem:[%s710_s4] sm:$0x1]  ;;  %v903_v11 = vrot.slane %v898_v6, 7  ;;  %v906_v12 = vrot.slane %v898_v6, 1  ;;  %v856_v13 = vld [vmem:[%s660_s15] sm:$0xff]  ;;  %s2141_s6 = smov 1  }
  0xc3   : > { %v853_v1 = vshrl.u32 %v848_v0, 7  ;;  %v932_v14 = vld [vmem:[%s720_s5] sm:$0xff]  ;;  %v857_v17 = vld [vmem:[%s670_s21 + $0x7] sm:$0x1]  ;;  %v869_v21 = vrot.slane %v856_v13, 7  ;;  %v872_v22 = vrot.slane %v856_v13, 1 }
  0xc4   : > { %v858_v18 = vld [vmem:[%s680_s12] sm:$0x1]  ;;  %v933_v23 = vld [vmem:[%s730_s18 + $0x7] sm:$0x1]  ;;  %v875_v30 = vmul.f32 2.0, %v856_v13  ;;  %v937_v35 = vrot.slane %v932_v14, 7 }
  0xc5   : > { %vm854_vm1 = vcmp.eq.s32.totalorder %v853_v1, 0  ;;  %vm855_vm3 = vcmp.eq.s32.totalorder %v853_v1, 7  ;;  %v934_v28 = vld [vmem:[%s740_s22] sm:$0x1]  ;;  %v940_v39 = vrot.slane %v932_v14, 1  ;;  %v909_v44 = vmul.f32 2.0, %v898_v6 }
  0xc6   : > { %v943_v47 = vmul.f32 2.0, %v932_v14  ;;  %v849_v52 = vand.u32 127, %v848_v0  ;;  %s2892_s15 = sld [smem:[#allocation39_spill]]  ;;  %s815_s10 = scalar_lea.vmem [#allocation17], %s2539_s20 }
  0xc7   : > { %p859_p2 = scmp.eq.s32.totalorder %s2887_s14, 0  ;;  %p864_p12 = scmp.eq.s32.totalorder %s2887_s14, 1 }
  0xc8   : > { %vm850_vm4 = vcmp.eq.s32.totalorder %v849_v52, 0  ;;  %vm851_vm5 = vcmp.eq.s32.totalorder %v849_v52, 127  ;;  %s822_s27 = scalar_lea.vmem [#allocation18], %s2539_s20  ;;  %s2893_s17 = sld [smem:[#allocation48_spill]] }
  0xc9   : > { %s860_s11 = scalar_select %p859_p2, 1, 0 }
  0xca   : > { %s865_s28 = scalar_select %p864_p12, 1, 0 }
  0xcb   : > { %v861_v2 = vstv %s860_s11  ;;  %s2894_s8 = sld [smem:[#allocation62_spill]]  ;;  %s1023_s12 = sshll.u32 %s822_s27, 4  ;;  %s1024_s12 = int_to_ptr.vmem [resolvable:$true] %s1023_s12 }
  0xcc   : > { %vm2603_vm0 = vcmp.eq.s32.totalorder %v861_v2, 1  ;;  %v866_v4 = vstv %s865_s28  ;;  %s1438_s13 = sshll.u32 %s2892_s15, 1  ;;  %s988_s30 = scalar_lea.sflag [#allocation19], %s2548_s29 }
  0xcd   : > { %vm2607_vm2 = vcmp.eq.s32.totalorder %v866_v4, 1  ;;  %v901_v9 = vsel %vm2603_vm0, 0.0, %v899_v7  ;;  %v863_v19 = vsel %vm2603_vm0, 0.0, %v857_v17  ;;  %v935_v31 = vsel %vm2603_vm0, 0.0, %v933_v23  ;;  %s1003_s9 = sadd.s32 %s2887_s14, %s1438_s13 }
  0xce   : > { %v902_v10 = vsel %vm2607_vm2, 0.0, %v900_v8  ;;  %v904_v15 = vperm.slane %v901_v9, 0  ;;  %v868_v20 = vsel %vm2607_vm2, 0.0, %v858_v18  ;;  %v870_v26 = vperm.slane %v863_v19, 0  ;;  %s2664_s21 = sshll.u32 %s1003_s9, 3  ;;  %p2895_p13 = scmp.ne.s32.totalorder %s2893_s17, 0 }
  0xcf   : > { %v907_v16 = vperm.slane %v902_v10, 0  ;;  %v873_v27 = vperm.slane %v868_v20, 0  ;;  %v936_v34 = vsel %vm2607_vm2, 0.0, %v934_v28  ;;  %v938_v38 = vperm.slane %v935_v31, 0 }
  0xd0   : > { %v905_v24 = vsel %vm854_vm1, %v904_v15, %v903_v11  ;;  %v871_v32 = vsel %vm854_vm1, %v870_v26, %v869_v21  ;;  %v941_v40 = vperm.slane %v936_v34, 0 }
  0xd1   : > { %v908_v25 = vsel %vm855_vm3, %v907_v16, %v906_v12  ;;  %v874_v33 = vsel %vm855_vm3, %v873_v27, %v872_v22  ;;  %v876_v37 = vadd.f32 %v875_v30, %v871_v32  ;;  %v939_v41 = vsel %vm854_vm1, %v938_v38, %v937_v35  ;;  %s1021_s2 = scalar_lea.hbm %s2894_s8, %s2664_s21  ;;  %s1916_s7 = scalar_lea.hbm %s2894_s8, 32 }
  0xd2   : > { %v912_v29 = vsub.f32 %v905_v24, %v908_v25  ;;  %v878_v36 = vsub.f32 %v871_v32, %v874_v33  ;;  %v942_v42 = vsel %vm855_vm3, %v941_v40, %v940_v39  ;;  %v910_v46 = vadd.f32 %v909_v44, %v905_v24  ;;  %s1025_s23 = sshll.u32 %s1021_s2, 4  ;;  %s1026_s23 = int_to_ptr.hbm [resolvable:$true] %s1025_s23 }
  0xd3   : > { %v877_v43 = vadd.f32 %v876_v37, %v874_v33  ;;  %v946_v45 = vsub.f32 %v939_v41, %v942_v42  ;;  %v944_v49 = vadd.f32 %v943_v47, %v939_v41  ;;  %s1910_s3 = sshra.s32 %s1026_s23, 4  ;;  %s1911_s3 = int_to_ptr.hbm [resolvable:$true] %s1910_s3 }
  0xd4   : > { %925 = vrot.lane.b32.xlu1 %v912_v29, %s2140_s19  ;;  %886 = vrot.lane.b32.xlu0 %v878_v36, %s2141_s6  ;;  %v911_v48 = vadd.f32 %v910_v46, %v908_v25  ;;  %v889_v63 = vmul.f32 2.0, %v878_v36  ;;  %v923_v3 = vmul.f32 2.0, %v912_v29  ;;  %s1912_s0 = scalar_lea.hbm %s1911_s3, 8  ;;  %p1917_p1 = scmp.lt.s32.totalorder %s1911_s3, %s2894_s8 }
  0xd5   : > { %891 = vrot.lane.b32.xlu2 %v878_v36, %s2140_s19  ;;  %v945_v50 = vadd.f32 %v944_v49, %v942_v42  ;;  %v957_v53 = vmul.f32 2.0, %v946_v45  ;;  %p1913_p8 = scmp.ne.s32.totalorder %s1911_s3, %s1912_s0  ;;  %p1918_p3 = scmp.lt.s32.totalorder %s1916_s7, %s1912_s0 }
  0xd7   : > { %p1914_p4 = pnand %p1913_p8, %p2895_p13  ;;  %p1919_p5 = por %p1918_p3, %p1917_p1 }
  0xd9   : > { %p1915_p9 = pneg %p1914_p4 }
  0xdb   : > { %p1920_p10 = pnand %p1919_p5, %p1915_p9 }
  0xdc   : > { %879 = vrot.lane.b32.xlu1 %v877_v43, %s2140_s19  ;;  %920 = vrot.lane.b32.xlu0 %v912_v29, %s2141_s6 }
  0xdd   : > { %954 = vrot.lane.b32.xlu2 %v946_v45, %s2141_s6 }
  0xe4   : > { %882 = vrot.lane.b32.xlu1 %v877_v43, %s2141_s6  ;;  %916 = vrot.lane.b32.xlu0 %v911_v48, %s2141_s6 }
  0xe5   : > { %913 = vrot.lane.b32.xlu2 %v911_v48, %s2140_s19 }
  0xec   : > { %950 = vrot.lane.b32.xlu1 %v945_v50, %s2141_s6  ;;  %947 = vrot.lane.b32.xlu0 %v945_v50, %s2140_s19 }
  0xed   : > { %959 = vrot.lane.b32.xlu2 %v946_v45, %s2140_s19 }
 0x12f   : > { %v892_v51 = vpop.permute.xlu2 %891 }
 0x130   : > { %v893_v7 = vsel %vm851_vm5, 0.0, %v892_v51 }
 0x137   : > { %v955_v54 = vpop.permute.xlu2 %954 }
 0x138   : > { %v956_v55 = vsel %vm850_vm4, 0.0, %v955_v54 }
 0x139   : > { %v958_v56 = vadd.f32 %v957_v53, %v956_v55 }
 0x13f   : > { %v914_v57 = vpop.permute.xlu2 %913 }
 0x140   : > { %v915_v11 = vsel %vm851_vm5, 0.0, %v914_v57 }
 0x146   : > { %v926_v58 = vpop.permute.xlu1 %925  ;;  %v887_v59 = vpop.permute.xlu0 %886 }
 0x147   : > { %v960_v60 = vpop.permute.xlu2 %959  ;;  %v888_v2 = vsel %vm850_vm4, 0.0, %v887_v59  ;;  %v927_v10 = vsel %vm851_vm5, 0.0, %v926_v58 }
 0x148   : > { %v961_v61 = vsel %vm851_vm5, 0.0, %v960_v60  ;;  %v890_v5 = vadd.f32 %v889_v63, %v888_v2 }
 0x149   : > { %v962_v62 = vadd.f32 %v961_v61, %v958_v56 }
 0x14a   : > { %v894_v8 = vadd.f32 %v893_v7, %v890_v5 }
 0x14b   : > { %v964_v30 = vand.u32 2147483647, %v962_v62 }
 0x14c   : > { %v896_v18 = vand.u32 2147483647, %v894_v8 }
 0x14e   : > { %v880_v1 = vpop.permute.xlu1 %879  ;;  %v921_v0 = vpop.permute.xlu0 %920 }
 0x14f   : > { %v922_v4 = vsel %vm850_vm4, 0.0, %v921_v0  ;;  %v881_v12 = vsel %vm851_vm5, 0.0, %v880_v1 }
 0x150   : > { %v924_v6 = vadd.f32 %v923_v3, %v922_v4 }
 0x152   : > { %v928_v14 = vadd.f32 %v927_v10, %v924_v6 }
 0x154   : > { %v930_v21 = vand.u32 2147483647, %v928_v14 }
 0x156   : > { %v883_v9 = vpop.permute.xlu1 %882  ;;  %v917_v15 = vpop.permute.xlu0 %916 }
 0x157   : > { %v884_v13 = vsel %vm850_vm4, 0.0, %v883_v9  ;;  %v918_v17 = vsel %vm850_vm4, 0.0, %v917_v15 }
 0x158   : > { %v885_v16 = vsub.f32 %v881_v12, %v884_v13  ;;  %v919_v19 = vsub.f32 %v915_v11, %v918_v17 }
 0x15a   : > { %v895_v20 = vand.u32 2147483647, %v885_v16  ;;  %v929_v22 = vand.u32 2147483647, %v919_v19 }
 0x15c   : > { %v897_v23 = vadd.f32 %v896_v18, %v895_v20  ;;  %v931_v24 = vadd.f32 %v930_v21, %v929_v22 }
 0x15e   : > { %v951_v25 = vpop.permute.xlu1 %950  ;;  %966 = vst [vmem:[%s815_s10] sm:$0xff] %v897_v23  ;;  %v948_v27 = vpop.permute.xlu0 %947  ;;  %v968_v33 = vmax.f32 %v897_v23, %v931_v24 }
 0x15f   : > { %v952_v26 = vsel %vm850_vm4, 0.0, %v951_v25  ;;  %967 = vst [vmem:[%s822_s27] sm:$0xff] %v931_v24  ;;  %v949_v28 = vsel %vm851_vm5, 0.0, %v948_v27 }
 0x160   : > { %v953_v29 = vsub.f32 %v949_v28, %v952_v26 }
 0x162   : > { %v963_v31 = vand.u32 2147483647, %v953_v29 }
 0x164   : > { %v965_v32 = vadd.f32 %v964_v30, %v963_v31 }
 0x166   : > { %v969_v34 = vsub.f32 %v965_v32, %v968_v33 }
 0x168   : > { %v970_v35 = vand.u32 2147483647, %v969_v34 }
 0x16a   : > { %971 = vadd.xlane.f32.xlu0 %v970_v35 }
 0x16b   : > { %1923 = shalt.err (!%p1920_p10)
}
 0x16c   : > { %1467 = dma.vmem_to_hbm [thread:$0]  (%p2895_p13), %s1024_s12, 128, %s1026_s23, %s988_s30  }
 0x16d   : > { %s2896_s28 = sld [smem:[#allocation61_spill]]  ;;  %s1007_s15 = sshll.u32 %s815_s10, 4  ;;  %s1008_s15 = int_to_ptr.vmem [resolvable:$true] %s1007_s15 }
 0x16e   : > { %s983_s13 = scalar_lea.sflag [#allocation4], %s2536_s16 }
 0x173   : > { %s2897_s6 = smov %s2896_s28  ;;  %s1005_s19 = scalar_lea.hbm %s2896_s28, %s2664_s21 }
 0x174   : > { %s1009_s27 = sshll.u32 %s1005_s19, 4  ;;  %s1944_s12 = scalar_lea.hbm %s2897_s6, 32  ;;  %s1010_s27 = int_to_ptr.hbm [resolvable:$true] %s1009_s27 }
 0x175   : > { %s1938_s9 = sshra.s32 %s1010_s27, 4  ;;  %s1939_s9 = int_to_ptr.hbm [resolvable:$true] %s1938_s9 }
 0x176   : > { %s1940_s25 = scalar_lea.hbm %s1939_s9, 8  ;;  %p1945_p11 = scmp.lt.s32.totalorder %s1939_s9, %s2897_s6 }
 0x177   : > { %p1941_p0 = scmp.ne.s32.totalorder %s1939_s9, %s1940_s25  ;;  %p1946_p2 = scmp.lt.s32.totalorder %s1944_s12, %s1940_s25 }
 0x179   : > { %p1942_p6 = pnand %p1941_p0, %p2895_p13  ;;  %p1947_p12 = por %p1946_p2, %p1945_p11 }
 0x17b   : > { %p1943_p7 = pneg %p1942_p6 }
 0x17d   : > { %p1948_p8 = pnand %p1947_p12, %p1943_p7 }
 0x17f   : > { %1951 = shalt.err (!%p1948_p8)
}
 0x180   : > { %1466 = dma.vmem_to_hbm [thread:$0]  (%p2895_p13), %s1008_s15, 128, %s1010_s27, %s983_s13  }
 0x181   : > { %s2898_s0 = sld [smem:[#allocation63_spill]]  ;;  %s829_s5 = scalar_lea.vmem [#allocation20], %s2539_s20 }
 0x182   : > { %s1039_s7 = sshll.u32 %s829_s5, 4  ;;  %s1040_s7 = int_to_ptr.vmem [resolvable:$true] %s1039_s7 }
 0x187   : > { %s1037_s4 = scalar_lea.hbm %s2898_s0, %s2664_s21  ;;  %s1972_s15 = scalar_lea.hbm %s2898_s0, 32 }
 0x188   : > { %s1041_s18 = sshll.u32 %s1037_s4, 4  ;;  %s1042_s18 = int_to_ptr.hbm [resolvable:$true] %s1041_s18 }
 0x189   : > { %s1966_s14 = sshra.s32 %s1042_s18, 4  ;;  %s1967_s14 = int_to_ptr.hbm [resolvable:$true] %s1966_s14 }
 0x18a   : > { %s1968_s11 = scalar_lea.hbm %s1967_s14, 8  ;;  %p1973_p3 = scmp.lt.s32.totalorder %s1967_s14, %s2898_s0 }
 0x18b   : > { %p1969_p4 = scmp.ne.s32.totalorder %s1967_s14, %s1968_s11  ;;  %p1974_p5 = scmp.lt.s32.totalorder %s1972_s15, %s1968_s11 }
 0x18d   : > { %p1970_p9 = pnand %p1969_p4, %p2895_p13  ;;  %p1975_p10 = por %p1974_p5, %p1973_p3 }
 0x18f   : > { %p1971_p1 = pneg %p1970_p9 }
 0x191   : > { %p1976_p0 = pnand %p1975_p10, %p1971_p1 }
 0x1dd   : > { %v972_v36 = vpop.xlane.xlu0 %971 }
 0x1de   : > { %v973_v37 = vrot.slane %v972_v36, 4 }
 0x1e0   : > { %v974_v38 = vadd.f32 %v973_v37, %v972_v36 }
 0x1e2   : > { %v975_v39 = vrot.slane %v974_v38, 2 }
 0x1e4   : > { %v976_v40 = vadd.f32 %v975_v39, %v974_v38 }
 0x1e6   : > { %v977_v41 = vrot.slane %v976_v40, 1 }
 0x1e8   : > { %v978_v42 = vadd.f32 %v977_v41, %v976_v40 }
 0x1ea   : > { %1446 = vpush %v978_v42 }
 0x21b   : > { %s1447_s22 = spop %1446 }
 0x21c   : > { %v980_v43 = vstv %s1447_s22 }
 0x21d   : > { %981 = vst [vmem:[%s829_s5] sm:$0xff] %v980_v43 }
 0x21e   : > { %1979 = shalt.err (!%p1976_p0)
}
 0x21f   : > { %1468 = dma.vmem_to_hbm [thread:$0]  (%p2895_p13), %s1040_s7, 128, %s1042_s18, %s988_s30  }
 0x220 PF: > { %s2899_s27 = sld [smem:[#allocation42_spill]] }
 0x221   : > { %s2900_s13 = sld [smem:[#allocation36_spill]] }
 0x222   : > { %s2901_s9 = sld [smem:[#allocation49_spill]] }
 0x226   : > { %p1511_p6 = scmp.ge.s32.totalorder %s2899_s27, 2 }
 0x227   : > { %s1053_s25 = sand.u32 1, %s2900_s13  }
 0x228   : > { %p2902_p7 = scmp.ne.s32.totalorder %s2901_s9, 0  ;;  %s1054_s26 = scalar_lea.sflag [#allocation4], %s1053_s25 }
 0x22a   : > { %p1501_p11 = pnand %p1511_p6, %p2902_p7 }
 0x22c   : > { %p1502_p2 = pneg %p1501_p11 }
 0x22e   : > { %2073 = dma.done.wait (%p1502_p2), %s1054_s26, 128  }
 0x22f   : > { %2075 = vsyncadd (%p1502_p2), %s1054_s26, 4294967168  ;;  %s2903_s2 = sadd.s32 4294967294, %s2899_s27  }
 0x230   : > { %s1063_s12 = sand.u32 1, %s2903_s2  }
 0x231   : > { %s1064_s23 = scalar_lea.sflag [#allocation19], %s1063_s12 }
 0x232   : > { %2077 = dma.done.wait (%p1502_p2), %s1064_s23, 256  }
 0x233   : > { %2079 = vsyncadd (%p1502_p2), %s1064_s23, 4294967040  ;;  %s43_s30 = sadd.s32 1, %s2899_s27   ;;  %s2905_s17 = sld [smem:[#allocation32_spill]] }
 0x234   : > { %p2724_p13 = scmp.ge.s32.totalorder %s43_s30, 6   ;;  %s2906_s18 = sld [smem:[#allocation33_spill]] }
 0x235   : > { %s2907_s19 = sld [smem:[#allocation51_spill]]  ;;  %s2918_s23 = smov %s2114_s24 }
 0x236   : > { %s2908_s20 = sld [smem:[#allocation34_spill]] }
 0x237   : > { %s2909_s21 = sld [smem:[#allocation35_spill]] }
 0x238   : > { %s2910_s22 = sld [smem:[#allocation46_spill]] }
 0x239   : > { %s2911_s3 = sld [smem:[#allocation37_spill]] }
 0x23a   : > { %s2912_s25 = sld [smem:[#allocation47_spill]] }
 0x23b   : > { %s2913_s26 = sld [smem:[#allocation40_spill]] }
 0x23c   : > { %s2914_s27 = sld [smem:[#allocation41_spill]] }
 0x23d   : > { %s2915_s28 = sld [smem:[#allocation43_spill]] }
 0x23e   : > { %s2916_s16 = sld [smem:[#allocation44_spill]] }
 0x23f   : > { %s2919_s24 = smov %s2911_s3 }
 0x240   :  { %42 = sbr.rel (!%p2724_p13) target bundleno = 33 (0x21), region = 229 }
 0x244   : > { %s2920_s29 = smov %s2916_s16 }
 0x245   :  { %1080 = vsyncpa [#allocation3], 1 }
 0x246   :  { %1082 = vsyncpa [#allocation3 + $0x1], 1 }
 0x247   :  { %1083 = vsyncpa [#allocation6], 1 }
 0x248   :  { %1085 = vsyncpa [#allocation6 + $0x1], 1 }
 0x249   :  { %1086 = vsyncpa [#allocation9], 1 }
 0x24a   :  { %1088 = vsyncpa [#allocation9 + $0x1], 1 }
 0x24b   :  { %1089 = vsyncpa [#allocation12], 1 }
 0x24c   :  { %1091 = vsyncpa [#allocation12 + $0x1], 1 }
 0x24d   :  { %1092 = vsyncpa [#allocation15], 1 }
 0x24e   :  { %1094 = vsyncpa [#allocation15 + $0x1], 1 }
 0x24f   :  { %1095 = vsyncpa [#allocation4], 1 }
 0x250   :  { %1097 = vsyncpa [#allocation4 + $0x1], 1 }
 0x251   :  { %1098 = vsyncpa [#allocation19], 1 }
 0x252   :  { %1100 = vsyncpa [#allocation19 + $0x1], 1 }

</bundles_post_ra>
